<compile_context>
chip_gen: v5e
topology: v5e:2x2
jax: 0.10.0
libtpu: 0.0.40
codegen_flags: <defaults>
</compile_context>

<pallas_src>
import functools

import jax
import jax.numpy as jnp
from jax.experimental import pallas as pl
from jax.experimental.pallas import tpu as pltpu  # noqa: F401  (TPU backend)


# ----------------------------- Pallas kernel --------------------------------

def _label_smoothing_kl_kernel(logits_ref, target_ref, loss_ref, *,
                               confidence, smoothing_value):
    """Fused log_softmax + label-smoothed KL-div (reduction='sum').

    logits_ref: [B, C] f32 VMEM
    target_ref: [B, 1] i32 VMEM
    loss_ref:   [1, 1] f32 VMEM (scalar result)
    """
    logits = logits_ref[...].astype(jnp.float32)            # [B, C]
    tgt = target_ref[...]                                    # [B, 1] int32

    # Numerically stable log-softmax along the class (lane) axis.
    m = jnp.max(logits, axis=-1, keepdims=True)
    z = logits - m
    lse = jnp.log(jnp.sum(jnp.exp(z), axis=-1, keepdims=True))
    log_q = z - lse                                          # [B, C]

    # Smoothed target distribution built with a vectorized mask
    # (equivalent to one_hot.repeat(...).scatter_(1, target, confidence)).
    col = jax.lax.broadcasted_iota(jnp.int32, logits.shape, dimension=1)
    p = jnp.where(col == tgt, confidence, smoothing_value)   # [B, C]

    # KL(p || q), reduction='sum':  sum_b,c  p * (log p - log q),
    # with the PyTorch convention that entries where p == 0 contribute 0.
    log_p = jnp.log(jnp.maximum(p, jnp.finfo(jnp.float32).tiny))
    kl = jnp.where(p > 0, p * (log_p - log_q), 0.0)

    loss_ref[...] = jnp.sum(kl, keepdims=True)               # (1, 1)


# ----------------------------- wrapper ---------------------------------------

def _full_spec(shape):
    # Whole-array block (no grid); shapes are tiny and fit VMEM trivially.
    return pl.BlockSpec(shape, lambda: (0,) * len(shape))


def label_smoothing_loss(output, target, *, smoothing):
    """output: [B, C] float logits, target: [B] int class ids -> scalar loss."""
    B, C = output.shape
    confidence = 1.0 - smoothing
    smoothing_value = smoothing / (C - 1)

    kernel = functools.partial(
        _label_smoothing_kl_kernel,
        confidence=float(confidence),
        smoothing_value=float(smoothing_value),
    )

    loss = pl.pallas_call(
        kernel,
        out_shape=jax.ShapeDtypeStruct((1, 1), jnp.float32),
        in_specs=[_full_spec((B, C)), _full_spec((B, 1))],
        out_specs=_full_spec((1, 1)),
    )(output.astype(jnp.float32), target.astype(jnp.int32).reshape(B, 1))

    return loss[0, 0]


# --------------------------------- main --------------------------------------

if __name__ == "__main__":
    B, C = 8, 4          # e.g. SWAG-style 4-way classification
    smoothing = 0.1

    key = jax.random.PRNGKey(0)
    k_logits, k_target = jax.random.split(key)
    output = jax.random.normal(k_logits, (B, C), jnp.float32)
    target = jax.random.randint(k_target, (B,), 0, C, dtype=jnp.int32)

    loss_fn = jax.jit(functools.partial(label_smoothing_loss, smoothing=smoothing))
    loss = loss_fn(output, target)
    jax.block_until_ready(loss)

    # Pure-JAX reference mirroring the PyTorch module.
    log_q = jax.nn.log_softmax(output, axis=1)
    p_ref = jnp.full((B, C), smoothing / (C - 1), jnp.float32)
    p_ref = p_ref.at[jnp.arange(B), target].set(1.0 - smoothing)
    ref = jnp.sum(jnp.where(p_ref > 0, p_ref * (jnp.log(p_ref) - log_q), 0.0))

    assert loss.shape == ()
    assert loss.dtype == jnp.float32
    assert jnp.allclose(loss, ref, rtol=1e-5, atol=1e-5), (loss, ref)
    print("KERNEL_OK")
</pallas_src>

<mosaic_0001>
module attributes {stable_mosaic.version = 11 : i64} {
  func.func @_label_smoothing_kl_kernel(%arg0: memref<8x4xf32, #tpu.memory_space<vmem>>, %arg1: memref<8x1xi32, #tpu.memory_space<vmem>>, %arg2: memref<1x1xf32, #tpu.memory_space<vmem>>) attributes {dimension_semantics = [], scalar_prefetch = 0 : i64, scratch_operands = 0 : i64, tpu.core_type = #tpu.core_type<tc>} {
    %c0 = arith.constant 0 : index
    %c0_0 = arith.constant 0 : index
    %0 = vector.load %arg0[%c0, %c0_0] : memref<8x4xf32, #tpu.memory_space<vmem>>, vector<8x4xf32>
    %c0_1 = arith.constant 0 : index
    %c0_2 = arith.constant 0 : index
    %1 = vector.load %arg1[%c0_1, %c0_2] : memref<8x1xi32, #tpu.memory_space<vmem>>, vector<8x1xi32>
    %cst = arith.constant dense<0xFF800000> : vector<8xf32>
    %2 = vector.multi_reduction <maximumf>, %0, %cst [1] : vector<8x4xf32> to vector<8xf32>
    %3 = vector.shape_cast %2 : vector<8xf32> to vector<8x1xf32>
    %4 = vector.broadcast %3 : vector<8x1xf32> to vector<8x4xf32>
    %5 = arith.subf %0, %4 : vector<8x4xf32>
    %6 = math.exp %5 : vector<8x4xf32>
    %cst_3 = arith.constant dense<0.000000e+00> : vector<8xf32>
    %7 = vector.multi_reduction <add>, %6, %cst_3 [1] : vector<8x4xf32> to vector<8xf32>
    %8 = vector.shape_cast %7 : vector<8xf32> to vector<8x1xf32>
    %9 = math.log %8 : vector<8x1xf32>
    %10 = vector.broadcast %9 : vector<8x1xf32> to vector<8x4xf32>
    %11 = arith.subf %5, %10 : vector<8x4xf32>
    %12 = tpu.iota {dimensions = array<i32: 1>} : vector<8x4xi32>
    %13 = vector.broadcast %1 : vector<8x1xi32> to vector<8x4xi32>
    %14 = arith.cmpi eq, %12, %13 : vector<8x4xi32>
    %cst_4 = arith.constant 0.899999976 : f32
    %cst_5 = arith.constant 0.0333333351 : f32
    %15 = vector.broadcast %cst_4 : f32 to vector<8x4xf32>
    %16 = vector.broadcast %cst_5 : f32 to vector<8x4xf32>
    %17 = arith.select %14, %15, %16 : vector<8x4xi1>, vector<8x4xf32>
    %cst_6 = arith.constant 1.17549435E-38 : f32
    %18 = vector.broadcast %cst_6 : f32 to vector<8x4xf32>
    %19 = arith.maximumf %17, %18 : vector<8x4xf32>
    %20 = math.log %19 : vector<8x4xf32>
    %cst_7 = arith.constant 0.000000e+00 : f32
    %21 = vector.broadcast %cst_7 : f32 to vector<8x4xf32>
    %22 = arith.cmpf ogt, %17, %21 : vector<8x4xf32>
    %23 = arith.subf %20, %11 : vector<8x4xf32>
    %24 = arith.mulf %17, %23 : vector<8x4xf32>
    %cst_8 = arith.constant 0.000000e+00 : f32
    %25 = vector.broadcast %cst_8 : f32 to vector<8x4xf32>
    %26 = arith.select %22, %24, %25 : vector<8x4xi1>, vector<8x4xf32>
    %27 = vector.shape_cast %26 : vector<8x4xf32> to vector<1x8x4xf32>
    %cst_9 = arith.constant dense<0.000000e+00> : vector<1xf32>
    %28 = vector.multi_reduction <add>, %27, %cst_9 [1, 2] : vector<1x8x4xf32> to vector<1xf32>
    %29 = vector.shape_cast %28 : vector<1xf32> to vector<1x1x1xf32>
    %30 = vector.extract %29[0, 0, 0] : f32 from vector<1x1x1xf32>
    %31 = vector.broadcast %30 : f32 to vector<1x1xf32>
    %c0_10 = arith.constant 0 : index
    %c0_11 = arith.constant 0 : index
    %32 = vector.load %arg2[%c0_10, %c0_11] : memref<1x1xf32, #tpu.memory_space<vmem>>, vector<1x1xf32>
    tpu.vector_store %arg2[%c0_10, %c0_11], %31 {strides = array<i32>} : memref<1x1xf32, #tpu.memory_space<vmem>>, vector<1x1xf32>,
    return
  }
}

</mosaic_0001>

<bundles_post_ra>
// kernel: label_smoothing_loss.1
= control target key start
LH: loop header
LB: loop body
LE: loop exit
PB: predicated region body
PF: predicated region fallthrough
CT: control target
= control target key end

     0   :  { %vm14_vm0 = vcmask 31744   ;;  %s138_s0 = inlined_call_operand.vmem [shape: f32[8,4], index: 0, kind: input, shape index: {}]   ;;  %s139_s1 = inlined_call_operand.vmem [shape: s32[8,1], index: 1, kind: input, shape index: {}]   ;;  %s140_s2 = inlined_call_operand.hbm [shape: f32[1,1], index: 2, kind: output, shape index: {}]  }
   0x1   :  { %v12_v0 = vld [vmem:[%s138_s0] sm:$0xff] }
   0x2   :  { %7 = vsyncpa [#allocation3], 0  ;;  %v15_v1 = vsel %vm14_vm0, %v12_v0, -inf  ;;  %v13_v2 = vld [vmem:[%s139_s1] sm:$0xff]  ;;  %v108_v3 = vmov 0   ;;  %v27_v9 = vlaneseq  ;;  %s110_s0 = smov [#allocation2]  }
   0x3   :  { %16 = vmax.xlane.f32.xlu0 %v15_v1  ;;  %v109_v12 = vmov 0.033333335   ;;  %s59_s1 = sshll.u32 %s110_s0, 4  ;;  %s61_s15 = sshll.u32 %s140_s2, 4  ;;  %vm52_vm3 = vcmask 0   ;;  %s60_s1 = int_to_ptr.vmem [resolvable:$true] %s59_s1  ;;  %s62_s15 = int_to_ptr.hbm [resolvable:$true] %s61_s15 }
   0x4   :  { %75 = vset.pattern.permute.xlu0 %v108_v3  ;;  %v28_v10 = vand.u32 127, %v27_v9 }
  0x17   :  { %30 = vperm.xlu0 %75, %v13_v2  }
  0x76   :  { %v17_v4 = vpop.xlane.xlu0 %16 }
  0x77   :  { %v18_v5 = vsub.f32 %v12_v0, %v17_v4 }
  0x79   :  { %v19_v6 = vmul.f32 1.442695, %v18_v5 }
  0x7b   :  { %76 = vpow2.f32 %v19_v6 }
  0x81   :  { %v77_v7 = vpop.eup %76 }
  0x82   :  { %v21_v8 = vsel %vm14_vm0, %v77_v7, 0.0 }
  0x83   :  { %22 = vadd.xlane.f32.xlu1 %v21_v8 }
  0x89   :  { %v31_v11 = vpop.permute.xlu0 %30 }
  0x8a   :  { %vm32_vm1 = vcmp.eq.s32.totalorder %v28_v10, %v31_v11 }
  0x8b   :  { %v33_v13 = vsel %vm32_vm1, 0.9, %v109_v12 }
  0x8c   :  { %v34_v14 = vmax.f32 %v33_v13, 1.1754944e-38  ;;  %vm37_vm2 = vcmp.gt.f32.partialorder %v33_v13, 0.0 }
  0x8e   :  { %78 = vlog2.f32 %v34_v14 }
  0x94   :  { %v79_v16 = vpop.eup %78 }
  0x95   :  { %v36_v18 = vmul.f32 0.6931472, %v79_v16 }
  0xf6   :  { %v23_v15 = vpop.xlane.xlu1 %22 }
  0xf7   :  { %80 = vlog2.f32 %v23_v15 }
  0xfd   :  { %v81_v17 = vpop.eup %80 }
  0xfe   :  { %v25_v19 = vmul.f32 0.6931472, %v81_v17 }
 0x100   :  { %v26_v20 = vsub.f32 %v18_v5, %v25_v19 }
 0x102   :  { %v38_v21 = vsub.f32 %v36_v18, %v26_v20 }
 0x104   :  { %v39_v22 = vmul.f32 %v38_v21, %v33_v13 }
 0x106   :  { %v40_v23 = vsel %vm37_vm2, %v39_v22, 0.0 }
 0x107   :  { %v41_v24 = vsel %vm14_vm0, %v40_v23, 0.0 }
 0x108   :  { %42 = vadd.xlane.f32.xlu1 %v41_v24 }
 0x17b   :  { %v43_v25 = vpop.xlane.xlu1 %42 }
 0x17c   :  { %v44_v26 = vrot.slane %v43_v25, 4 }
 0x17e   :  { %v45_v27 = vadd.f32 %v44_v26, %v43_v25 }
 0x180   :  { %v46_v28 = vrot.slane %v45_v27, 2 }
 0x182   :  { %v47_v29 = vadd.f32 %v46_v28, %v45_v27 }
 0x184   :  { %v48_v30 = vrot.slane %v47_v29, 1 }
 0x186   :  { %v49_v31 = vadd.f32 %v48_v30, %v47_v29 }
 0x188   :  { %70 = vpush %v49_v31 }
 0x1b9   :  { %s71_s16 = spop %70 }
 0x1ba   :  { %v51_v32 = vstv %s71_s16 }
 0x1bb   :  { %53 = vst.msk [vmem:[#allocation2] sm:$0x1] %vm52_vm3, %v51_v32 }
 0x1bc   :  { %64 = dma.vmem_to_hbm [thread:$0]  %s60_s1, 16, %s62_s15, [#allocation3]  }
 0x1bd   :  { %106 = dma.done.wait [#allocation3], 16  }
 0x1be   :  { %107 = vsyncadd [#allocation3], 4294967280 }
 0x1bf   :  { %69 = vsyncpa [#allocation3], 1 }

</bundles_post_ra>
